<compile_context>
chip_gen: v7x
topology: tpu7x:2x2x1
jax: 0.10.0
libtpu: 0.0.40
codegen_flags: <defaults>
</compile_context>

<pallas_src>
import functools

import jax
import jax.numpy as jnp
from jax import lax
from jax.experimental import pallas as pl
from jax.experimental.pallas import tpu as pltpu


def _round_up(x, m):
    return ((x + m - 1) // m) * m


@functools.lru_cache(maxsize=None)
def _vmem_budget_bytes():
    # Conservative fallback = v7x physical per-TC VMEM.
    cap = 64 * 1024 * 1024
    try:
        cap = int(pltpu.get_tpu_info().vmem_capacity_bytes)
    except Exception:
        pass
    return (cap * 3) // 4          # leave headroom for compiler scratch / spills


# ---------------------------------------------------------------------------
# Kernel A: one-shot prototype work (normalize rows, gram, textloss).
# Emits the prototypes already scaled by 1/temperature and cast to bf16.
# ---------------------------------------------------------------------------
def _proto_kernel(proto_ref, protos_out_ref, text_ref, *, inv_temp):
    proto = proto_ref[...].astype(jnp.float32)                 # (C, D)
    sq = jnp.sum(proto * proto, axis=1, keepdims=True)         # (C, 1)
    # F.normalize(dim=1, eps=1e-12):  x / max(||x||, 1e-12)
    #   == x * rsqrt(max(||x||^2, 1e-24))   (one EUP rsqrt + VPU multiply)
    protos = proto * lax.rsqrt(jnp.maximum(sq, 1e-24))         # (C, D)

    # Fold 1/temperature into the prototypes Kernel B consumes.  The gram /
    # textloss below must use the *unscaled* normalized prototypes.
    protos_out_ref[...] = (protos * inv_temp).astype(protos_out_ref.dtype)

    # Rows are L2-normalized => gram entries in [-1, 1]; exp() cannot overflow.
    gram = lax.dot_general(
        protos, protos,
        dimension_numbers=(((1,), (1,)), ((), ())),
        preferred_element_type=jnp.float32)                    # (C, C)
    C = proto.shape[0]
    ri = lax.broadcasted_iota(jnp.int32, (C, C), 0)
    ci = lax.broadcasted_iota(jnp.int32, (C, C), 1)
    off_diag = jnp.where(ri == ci, 0.0, jnp.exp(gram))         # exact diag mask
    tsum = jnp.sum(jnp.sum(off_diag, axis=1, keepdims=True),
                   axis=0, keepdims=True)                      # (1, 1)
    text_ref[...] = jnp.log(tsum) / float(C)


# ---------------------------------------------------------------------------
# Kernel B: per-B-tile CE + prototype-similarity partial sums.
# ---------------------------------------------------------------------------
def _batch_kernel(feat_ref, logits_ref, labels_ref, proto_ref, out_ref, *,
                  batch, tile_b, mask_rows):
    logits = logits_ref[...].astype(jnp.float32)   # (tB, C)  full-extent class dim
    labels = labels_ref[...]                       # (tB, 1)  int32
    tB, C = logits.shape

    cols = lax.broadcasted_iota(jnp.int32, (tB, C), 1)
    onehot = (labels == cols).astype(jnp.float32)              # (tB, C)

    # ---- cross entropy on the classifier logits (exact f32) ----
    lmax = jnp.max(logits, axis=1, keepdims=True)
    sh = logits - lmax
    lse = jnp.log(jnp.sum(jnp.exp(sh), axis=1, keepdims=True))
    ce_row = jnp.sum(onehot * sh, axis=1, keepdims=True) - lse        # (tB, 1)

    # ---- prototype-similarity loss ----
    # bf16 operands, f32 accumulation on the MXU.  Temperature is already
    # folded into proto_ref by Kernel A.
    feat = feat_ref[...].astype(proto_ref.dtype)                       # (tB, D) bf16
    fdp = lax.dot_general(
        feat, proto_ref[...],
        dimension_numbers=(((1,), (1,)), ((), ())),
        preferred_element_type=jnp.float32)                            # (tB, C)
    fmax = jnp.max(fdp, axis=1, keepdims=True)
    sh2 = fdp - fmax
    lse2 = jnp.log(jnp.sum(jnp.exp(sh2), axis=1, keepdims=True))
    sim_row = jnp.sum(onehot * sh2, axis=1, keepdims=True) - lse2      # (tB, 1)

    if mask_rows:
        rows = lax.broadcasted_iota(jnp.int32, (tB, 1), 0)
        valid = ((pl.program_id(0) * tile_b + rows) < batch).astype(jnp.float32)
        ce_row = ce_row * valid
        sim_row = sim_row * valid

    ce_part = -jnp.sum(ce_row, axis=0, keepdims=True)     # (1, 1)
    sim_part = -jnp.sum(sim_row, axis=0, keepdims=True)   # (1, 1)

    # Lane-dense unmasked (1, 8, 128) store: sublane 0 = CE, sublane 1 = sim.
    sub = lax.broadcasted_iota(jnp.int32, (1, 8, 128), 1)
    out_ref[...] = jnp.where(sub == 0, ce_part,
                             jnp.where(sub == 1, sim_part, 0.0))


# ---------------------------------------------------------------------------
# Tile-size selection (VMEM-budget aware, 2-TC / MXU friendly).
# ---------------------------------------------------------------------------
def _pick_tile_b(B, D, C, feat_itemsize, logits_itemsize, budget):
    tB = min(_round_up(B, 8), 1024)
    if B > 8:
        # Give the second TensorCore work on v7x (no effect on 1-TC chips).
        tB = min(tB, max(8, _round_up((B + 1) // 2, 8)))
    if tB >= 512:
        tB = (tB // 256) * 256        # 256-multiples feed the v6e/v7x MXU fully

    lane_c = max(_round_up(C, 128), 128)
    lane_d = max(_round_up(D, 128), 128)

    def fits(t):
        streamed = 2 * (t * D * feat_itemsize        # feat tile, double-buffered
                        + t * C * logits_itemsize    # logits tile
                        + t * 512)                   # labels tile (lane-padded)
        resident = 2 * C * D * 2                     # bf16 protos, default 2x buffered
        interm = 5 * t * lane_c * 4 + 3 * t * lane_d * 4   # f32 in-kernel temporaries
        out = 2 * 8 * 128 * 4
        return streamed + resident + interm + out <= budget

    while tB > 8 and not fits(tB):
        tB = max(8, _round_up(tB // 2, 8))
    return tB


# ---------------------------------------------------------------------------
# Wrapper
# ---------------------------------------------------------------------------
@functools.partial(jax.jit, static_argnames=("alpha", "beta", "temperature"))
def itloss(features_front, logits, labels, text_prototype,
           alpha: float = 1.0, beta: float = 1.0, temperature: float = 0.1):
    B, D = features_front.shape
    C = logits.shape[1]
    assert text_prototype.shape == (C, D)

    budget = _vmem_budget_bytes()
    inv_temp = float(1.0 / temperature)
    compute_dtype = jnp.bfloat16   # MXU-native on v5e/v6e/v7x

    # Kernel A materializes the full (C, C) gram; guard against VMEM OOM.
    # TODO(synk): tile Kernel A over prototype row blocks for very large C.
    if 3 * C * C * 4 + 3 * C * D * 4 > budget:
        raise ValueError(
            f"num_class={C} too large for the one-shot prototype kernel "
            f"(needs ~{3 * C * C * 4 + 3 * C * D * 4} B VMEM, budget {budget} B)")

    # ---- Kernel A: one-shot prototype normalization + textloss ----
    protos_scaled, textloss = pl.pallas_call(
        functools.partial(_proto_kernel, inv_temp=inv_temp),
        out_shape=(jax.ShapeDtypeStruct((C, D), compute_dtype),
                   jax.ShapeDtypeStruct((1, 1), jnp.float32)),
        in_specs=[pl.BlockSpec(memory_space=pltpu.MemorySpace.VMEM)],
        out_specs=(pl.BlockSpec(memory_space=pltpu.MemorySpace.VMEM),
                   pl.BlockSpec(memory_space=pltpu.MemorySpace.VMEM)),
        compiler_params=pltpu.CompilerParams(vmem_limit_bytes=budget),
    )(text_prototype)

    # ---- Kernel B setup: no column padding; batch pad only if needed ----
    tB = _pick_tile_b(B, D, C,
                      features_front.dtype.itemsize, logits.dtype.itemsize,
                      budget)
    Bp = _round_up(B, tB)
    num_tiles = Bp // tB

    labels_i32 = labels.reshape(-1).astype(jnp.int32)
    if Bp != B:
        feat_in = jnp.zeros((Bp, D), features_front.dtype).at[:B].set(features_front)
        logits_in = jnp.zeros((Bp, C), logits.dtype).at[:B].set(logits)
        labels_in = jnp.zeros((Bp, 1), jnp.int32).at[:B, 0].set(labels_i32)
    else:
        feat_in = features_front
        logits_in = logits
        labels_in = labels_i32.reshape(B, 1)

    kernel = functools.partial(
        _batch_kernel, batch=B, tile_b=tB, mask_rows=(Bp != B))

    # TODO(synk): for num_class in the tens of thousands, add a class-blocked
    # grid axis with an online-softmax accumulator instead of a resident
    # (C, D) protos block.
    partials = pl.pallas_call(
        kernel,
        out_shape=jax.ShapeDtypeStruct((num_tiles, 8, 128), jnp.float32),
        grid=(num_tiles,),
        in_specs=[
            pl.BlockSpec((tB, D), lambda i: (i, 0)),
            pl.BlockSpec((tB, C), lambda i: (i, 0)),   # full-extent class dim
            pl.BlockSpec((tB, 1), lambda i: (i, 0)),
            pl.BlockSpec((C, D), lambda i: (0, 0)),    # resident across the grid
        ],
        out_specs=pl.BlockSpec((1, 8, 128), lambda i: (i, 0, 0)),
        compiler_params=pltpu.CompilerParams(
            dimension_semantics=("parallel",),
            vmem_limit_bytes=budget),
    )(feat_in, logits_in, labels_in, protos_scaled)

    ce_mean = jnp.sum(partials[:, 0, 0]) / B
    sim_mean = jnp.sum(partials[:, 1, 0]) / B
    return alpha * sim_mean + beta * ce_mean + textloss[0, 0]


# ---------------------------------------------------------------------------
# Pure-JAX reference mirroring the PyTorch forward (full f32).
# ---------------------------------------------------------------------------
def _itloss_ref(features_front, logits, labels, text_prototype,
                alpha=1.0, beta=1.0, temperature=0.1):
    C = logits.shape[1]
    labels = labels.astype(jnp.int32)
    mask = (labels[:, None] == jnp.arange(C)[None, :]).astype(jnp.float32)

    log_sm = jax.nn.log_softmax(logits, axis=1)
    loss_ce = -jnp.mean(jnp.sum(mask * log_sm, axis=1))

    protos = text_prototype / jnp.maximum(
        jnp.linalg.norm(text_prototype, axis=1, keepdims=True), 1e-12)
    fdp = features_front @ protos.T / temperature
    log_prob = fdp - jax.scipy.special.logsumexp(fdp, axis=1, keepdims=True)
    simloss = -jnp.mean(jnp.sum(mask * log_prob, axis=1))

    gram = protos @ protos.T
    off = jnp.where(jnp.eye(C, dtype=bool), 0.0, jnp.exp(gram))
    textloss = jnp.log(jnp.sum(off)) / C
    return alpha * simloss + beta * loss_ce + textloss


if __name__ == "__main__":
    B, D, C = 8, 32, 4  # batch, feature dim, num_class

    key = jax.random.PRNGKey(0)
    k1, k2, k3, k4 = jax.random.split(key, 4)
    features = jax.random.normal(k1, (B, D), dtype=jnp.float32)
    logits = jax.random.normal(k2, (B, C), dtype=jnp.float32)
    labels = jax.random.randint(k3, (B,), 0, C, dtype=jnp.int32)
    text_prototype = jax.random.normal(k4, (C, D), dtype=jnp.float32)

    loss = itloss(features, logits, labels, text_prototype, alpha=1.0, beta=1.0)
    loss = jax.block_until_ready(loss)

    ref = _itloss_ref(features, logits, labels, text_prototype)
    # Tolerance loosened vs v2: the prototype-similarity matmul now runs
    # bf16-in / f32-acc on the MXU (standard mixed precision), per perf review.
    assert jnp.allclose(loss, ref, rtol=5e-2, atol=5e-2), (loss, ref)

    print("KERNEL_OK")
</pallas_src>

<mosaic_0001>
module attributes {stable_mosaic.version = 11 : i64} {
  func.func @_proto_kernel(%arg0: memref<4x32xf32, #tpu.memory_space<vmem>>, %arg1: memref<4x32xbf16, #tpu.memory_space<vmem>>, %arg2: memref<1x1xf32, #tpu.memory_space<vmem>>) attributes {dimension_semantics = [], scalar_prefetch = 0 : i64, scratch_operands = 0 : i64, tpu.core_type = #tpu.core_type<tc>} {
    %c0 = arith.constant 0 : index
    %c0_0 = arith.constant 0 : index
    %0 = vector.load %arg0[%c0, %c0_0] : memref<4x32xf32, #tpu.memory_space<vmem>>, vector<4x32xf32>
    %1 = arith.mulf %0, %0 : vector<4x32xf32>
    %cst = arith.constant dense<0.000000e+00> : vector<4xf32>
    %2 = vector.multi_reduction <add>, %1, %cst [1] : vector<4x32xf32> to vector<4xf32>
    %3 = vector.shape_cast %2 : vector<4xf32> to vector<4x1xf32>
    %cst_1 = arith.constant 1.000000e-24 : f32
    %4 = vector.broadcast %cst_1 : f32 to vector<4x1xf32>
    %5 = arith.maximumf %3, %4 : vector<4x1xf32>
    %6 = math.rsqrt %5 : vector<4x1xf32>
    %7 = vector.broadcast %6 : vector<4x1xf32> to vector<4x32xf32>
    %8 = arith.mulf %0, %7 : vector<4x32xf32>
    %cst_2 = arith.constant 1.000000e+01 : f32
    %9 = vector.broadcast %cst_2 : f32 to vector<4x32xf32>
    %10 = arith.mulf %8, %9 : vector<4x32xf32>
    %11 = arith.truncf %10 : vector<4x32xf32> to vector<4x32xbf16>
    %c0_3 = arith.constant 0 : index
    %c0_4 = arith.constant 0 : index
    %12 = vector.load %arg1[%c0_3, %c0_4] : memref<4x32xbf16, #tpu.memory_space<vmem>>, vector<4x32xbf16>
    tpu.vector_store %arg1[%c0_3, %c0_4], %11 {strides = array<i32>} : memref<4x32xbf16, #tpu.memory_space<vmem>>, vector<4x32xbf16>,
    %cst_5 = arith.constant dense<0.000000e+00> : vector<4x4xf32>
    %13 = tpu.matmul %8, %8, %cst_5 {dimension_numbers = #tpu.dot_dimension_numbers<[1], [1], [0], [0], [0, 0, 1, 0], [], []>} : vector<4x32xf32>, vector<4x32xf32>, vector<4x4xf32> -> vector<4x4xf32>
    %14 = tpu.iota {dimensions = array<i32: 0>} : vector<4x4xi32>
    %15 = tpu.iota {dimensions = array<i32: 1>} : vector<4x4xi32>
    %16 = arith.cmpi eq, %14, %15 : vector<4x4xi32>
    %17 = math.exp %13 : vector<4x4xf32>
    %cst_6 = arith.constant 0.000000e+00 : f32
    %18 = vector.broadcast %cst_6 : f32 to vector<4x4xf32>
    %19 = arith.select %16, %18, %17 : vector<4x4xi1>, vector<4x4xf32>
    %cst_7 = arith.constant dense<0.000000e+00> : vector<4xf32>
    %20 = vector.multi_reduction <add>, %19, %cst_7 [1] : vector<4x4xf32> to vector<4xf32>
    %21 = vector.shape_cast %20 : vector<4xf32> to vector<4x1xf32>
    %cst_8 = arith.constant dense<0.000000e+00> : vector<1xf32>
    %22 = vector.multi_reduction <add>, %21, %cst_8 [0] : vector<4x1xf32> to vector<1xf32>
    %23 = vector.shape_cast %22 : vector<1xf32> to vector<1x1xf32>
    %24 = math.log %23 : vector<1x1xf32>
    %cst_9 = arith.constant 4.000000e+00 : f32
    %25 = vector.broadcast %cst_9 : f32 to vector<1x1xf32>
    %26 = arith.divf %24, %25 : vector<1x1xf32>
    %c0_10 = arith.constant 0 : index
    %c0_11 = arith.constant 0 : index
    %27 = vector.load %arg2[%c0_10, %c0_11] : memref<1x1xf32, #tpu.memory_space<vmem>>, vector<1x1xf32>
    tpu.vector_store %arg2[%c0_10, %c0_11], %26 {strides = array<i32>} : memref<1x1xf32, #tpu.memory_space<vmem>>, vector<1x1xf32>,
    return
  }
}

module attributes {stable_mosaic.version = 11 : i64} {
  func.func @_batch_kernel(%arg0: i32, %arg1: memref<8x32xf32, #tpu.memory_space<vmem>>, %arg2: memref<8x4xf32, #tpu.memory_space<vmem>>, %arg3: memref<8x1xi32, #tpu.memory_space<vmem>>, %arg4: memref<4x32xbf16, #tpu.memory_space<vmem>>, %arg5: memref<1x8x128xf32, #tpu.memory_space<vmem>>) attributes {dimension_semantics = [#tpu.dimension_semantics<parallel>], iteration_bounds = array<i64: 1>, scalar_prefetch = 0 : i64, scratch_operands = 0 : i64, tpu.core_type = #tpu.core_type<tc>, window_params = [{transform_indices = @transform_0, window_bounds = array<i64: 8, 32>}, {transform_indices = @transform_1, window_bounds = array<i64: 8, 4>}, {transform_indices = @transform_2, window_bounds = array<i64: 8, 1>}, {pipeline_mode = #tpu.pipeline_mode<synchronous>, transform_indices = @transform_3, window_bounds = array<i64: 4, 32>}, {transform_indices = @transform_4, window_bounds = array<i64: 1, 8, 128>}]} {
    %c0 = arith.constant 0 : index
    %c0_0 = arith.constant 0 : index
    %0 = vector.load %arg2[%c0, %c0_0] : memref<8x4xf32, #tpu.memory_space<vmem>>, vector<8x4xf32>
    %c0_1 = arith.constant 0 : index
    %c0_2 = arith.constant 0 : index
    %1 = vector.load %arg3[%c0_1, %c0_2] : memref<8x1xi32, #tpu.memory_space<vmem>>, vector<8x1xi32>
    %2 = tpu.iota {dimensions = array<i32: 1>} : vector<8x4xi32>
    %3 = vector.broadcast %1 : vector<8x1xi32> to vector<8x4xi32>
    %4 = arith.cmpi eq, %3, %2 : vector<8x4xi32>
    %5 = arith.extui %4 : vector<8x4xi1> to vector<8x4xi32>
    %6 = arith.sitofp %5 : vector<8x4xi32> to vector<8x4xf32>
    %cst = arith.constant dense<0xFF800000> : vector<8xf32>
    %7 = vector.multi_reduction <maximumf>, %0, %cst [1] : vector<8x4xf32> to vector<8xf32>
    %8 = vector.shape_cast %7 : vector<8xf32> to vector<8x1xf32>
    %9 = vector.broadcast %8 : vector<8x1xf32> to vector<8x4xf32>
    %10 = arith.subf %0, %9 : vector<8x4xf32>
    %11 = math.exp %10 : vector<8x4xf32>
    %cst_3 = arith.constant dense<0.000000e+00> : vector<8xf32>
    %12 = vector.multi_reduction <add>, %11, %cst_3 [1] : vector<8x4xf32> to vector<8xf32>
    %13 = vector.shape_cast %12 : vector<8xf32> to vector<8x1xf32>
    %14 = math.log %13 : vector<8x1xf32>
    %15 = arith.mulf %6, %10 : vector<8x4xf32>
    %cst_4 = arith.constant dense<0.000000e+00> : vector<8xf32>
    %16 = vector.multi_reduction <add>, %15, %cst_4 [1] : vector<8x4xf32> to vector<8xf32>
    %17 = vector.shape_cast %16 : vector<8xf32> to vector<8x1xf32>
    %18 = arith.subf %17, %14 : vector<8x1xf32>
    %c0_5 = arith.constant 0 : index
    %c0_6 = arith.constant 0 : index
    %19 = vector.load %arg1[%c0_5, %c0_6] : memref<8x32xf32, #tpu.memory_space<vmem>>, vector<8x32xf32>
    %20 = arith.truncf %19 : vector<8x32xf32> to vector<8x32xbf16>
    %c0_7 = arith.constant 0 : index
    %c0_8 = arith.constant 0 : index
    %21 = vector.load %arg4[%c0_7, %c0_8] : memref<4x32xbf16, #tpu.memory_space<vmem>>, vector<4x32xbf16>
    %cst_9 = arith.constant dense<0.000000e+00> : vector<8x4xf32>
    %22 = tpu.matmul %20, %21, %cst_9 {dimension_numbers = #tpu.dot_dimension_numbers<[1], [1], [0], [0], [0, 0, 1, 0], [], []>} : vector<8x32xbf16>, vector<4x32xbf16>, vector<8x4xf32> -> vector<8x4xf32>
    %cst_10 = arith.constant dense<0xFF800000> : vector<8xf32>
    %23 = vector.multi_reduction <maximumf>, %22, %cst_10 [1] : vector<8x4xf32> to vector<8xf32>
    %24 = vector.shape_cast %23 : vector<8xf32> to vector<8x1xf32>
    %25 = vector.broadcast %24 : vector<8x1xf32> to vector<8x4xf32>
    %26 = arith.subf %22, %25 : vector<8x4xf32>
    %27 = math.exp %26 : vector<8x4xf32>
    %cst_11 = arith.constant dense<0.000000e+00> : vector<8xf32>
    %28 = vector.multi_reduction <add>, %27, %cst_11 [1] : vector<8x4xf32> to vector<8xf32>
    %29 = vector.shape_cast %28 : vector<8xf32> to vector<8x1xf32>
    %30 = math.log %29 : vector<8x1xf32>
    %31 = arith.mulf %6, %26 : vector<8x4xf32>
    %cst_12 = arith.constant dense<0.000000e+00> : vector<8xf32>
    %32 = vector.multi_reduction <add>, %31, %cst_12 [1] : vector<8x4xf32> to vector<8xf32>
    %33 = vector.shape_cast %32 : vector<8xf32> to vector<8x1xf32>
    %34 = arith.subf %33, %30 : vector<8x1xf32>
    %cst_13 = arith.constant dense<0.000000e+00> : vector<1xf32>
    %35 = vector.multi_reduction <add>, %18, %cst_13 [0] : vector<8x1xf32> to vector<1xf32>
    %36 = vector.shape_cast %35 : vector<1xf32> to vector<1x1xf32>
    %cst_14 = arith.constant 0.000000e+00 : f32
    %37 = vector.broadcast %cst_14 : f32 to vector<1x1xf32>
    %38 = arith.subf %37, %36 : vector<1x1xf32>
    %cst_15 = arith.constant dense<0.000000e+00> : vector<1xf32>
    %39 = vector.multi_reduction <add>, %34, %cst_15 [0] : vector<8x1xf32> to vector<1xf32>
    %40 = vector.shape_cast %39 : vector<1xf32> to vector<1x1xf32>
    %cst_16 = arith.constant 0.000000e+00 : f32
    %41 = vector.broadcast %cst_16 : f32 to vector<1x1xf32>
    %42 = arith.subf %41, %40 : vector<1x1xf32>
    %43 = tpu.iota {dimensions = array<i32: 1>} : vector<1x8x128xi32>
    %c0_i32 = arith.constant 0 : i32
    %44 = vector.broadcast %c0_i32 : i32 to vector<1x8x128xi32>
    %45 = arith.cmpi eq, %43, %44 : vector<1x8x128xi32>
    %c1_i32 = arith.constant 1 : i32
    %46 = vector.broadcast %c1_i32 : i32 to vector<1x8x128xi32>
    %47 = arith.cmpi eq, %43, %46 : vector<1x8x128xi32>
    %cst_17 = arith.constant 0.000000e+00 : f32
    %48 = vector.shape_cast %42 : vector<1x1xf32> to vector<1x1x1xf32>
    %49 = vector.broadcast %48 : vector<1x1x1xf32> to vector<1x8x128xf32>
    %50 = vector.broadcast %cst_17 : f32 to vector<1x8x128xf32>
    %51 = arith.select %47, %49, %50 : vector<1x8x128xi1>, vector<1x8x128xf32>
    %52 = vector.shape_cast %38 : vector<1x1xf32> to vector<1x1x1xf32>
    %53 = vector.broadcast %52 : vector<1x1x1xf32> to vector<1x8x128xf32>
    %54 = arith.select %45, %53, %51 : vector<1x8x128xi1>, vector<1x8x128xf32>
    %c0_18 = arith.constant 0 : index
    %c0_19 = arith.constant 0 : index
    %c0_20 = arith.constant 0 : index
    %55 = vector.load %arg5[%c0_18, %c0_19, %c0_20] : memref<1x8x128xf32, #tpu.memory_space<vmem>>, vector<1x8x128xf32>
    tpu.vector_store %arg5[%c0_18, %c0_19, %c0_20], %54 {strides = array<i32>} : memref<1x8x128xf32, #tpu.memory_space<vmem>>, vector<1x8x128xf32>,
    return
  }
  func.func @transform_0(%arg0: i32) -> (i32, i32) {
    %c0_i32 = arith.constant 0 : i32
    %c0_i32_0 = arith.constant 0 : i32
    return %arg0, %c0_i32 : i32, i32
  }
  func.func @transform_1(%arg0: i32) -> (i32, i32) {
    %c0_i32 = arith.constant 0 : i32
    %c0_i32_0 = arith.constant 0 : i32
    return %arg0, %c0_i32 : i32, i32
  }
  func.func @transform_2(%arg0: i32) -> (i32, i32) {
    %c0_i32 = arith.constant 0 : i32
    %c0_i32_0 = arith.constant 0 : i32
    return %arg0, %c0_i32 : i32, i32
  }
  func.func @transform_3(%arg0: i32) -> (i32, i32) {
    %c0_i32 = arith.constant 0 : i32
    %c0_i32_0 = arith.constant 0 : i32
    %c0_i32_1 = arith.constant 0 : i32
    return %c0_i32, %c0_i32_0 : i32, i32
  }
  func.func @transform_4(%arg0: i32) -> (i32, i32, i32) {
    %c0_i32 = arith.constant 0 : i32
    %c0_i32_0 = arith.constant 0 : i32
    %c0_i32_1 = arith.constant 0 : i32
    return %arg0, %c0_i32, %c0_i32_0 : i32, i32, i32
  }
}

</mosaic_0001>

<bundles_post_ra>
// kernel: itloss.2
= control target key start
LH: loop header
LB: loop body
LE: loop exit
PB: predicated region body
PF: predicated region fallthrough
CT: control target
= control target key end

     0   :  { %vm13_vm0 = vcmask 257024   ;;  %s220_s0 = inlined_call_operand.vmem [shape: f32[4,32], index: 0, kind: input, shape index: {}]   ;;  %s221_s1 = inlined_call_operand.vmem [shape: bf16[4,32], index: 1, kind: output, shape index: {0}]   ;;  %s222_s2 = inlined_call_operand.hbm [shape: f32[1,1], index: 2, kind: output, shape index: {1}]  }
   0x1   :  { %v11_v0 = vld [vmem:[%s220_s0] sm:$0xf] }
   0x2   :  { %8 = vsyncpa [#allocation3], 0  ;;  %v12_v1 = vmul.f32 %v11_v0, %v11_v0  ;;  %v184_v3 = vmov 0.0   ;;  %vm185_vm1 = vmmov 0   ;;  %vm24_vm2 = vcmask 261120  }
   0x3   :  { %146 = vmatprep.subr.mxu0 %v184_v3  ;;  %148 = vmatprep.mubr.msk.f32.mxu0 %vm185_vm1, %v184_v3  ;;  %vm22_vm3 = vcmask 254976   ;;  %v98_v13 = vlaneseq  ;;  %vm106_vm5 = vcmask 27648   ;;  %vm110_vm6 = vcmask 1043456  }
   0x4   :  { %v14_v2 = vsel %vm13_vm0, %v12_v1, 0.0  ;;  %vm122_vm7 = vcmask 0  }
   0x5   :  { %15 = vadd.xlane.f32.xlu0 %v14_v2  ;;  %v99_v14 = vshrl.u32 %v98_v13, 7  ;;  %v101_v15 = vand.u32 127, %v98_v13 }
   0x7   :  { %vm102_vm4 = vcmp.eq.s32.totalorder %v99_v14, %v101_v15 }
  0x92   :  { %v16_v4 = vpop.xlane.xlu0 %15 }
  0x93   :  { %v17_v5 = vmax.f32 %v16_v4, 1e-24 }
  0x95   :  { %154 = vrsqrt.f32 %v17_v5 }
  0x9f   :  { %v155_v6 = vpop.eup %154 }
  0xa0   :  { %v19_v7 = vmul.f32 %v155_v6, %v11_v0 }
  0xa2   :  { %v20_v8 = vmul.f32 10.0, %v19_v7  ;;  %147 = vmatpush3.xpose.msk.msra.mxu0 %vm24_vm2, %v19_v7 }
  0xa4   :  { %v21_v9 = vpack.c.bf16 %v20_v8, %v20_v8 }
  0xa5   :  { %149 = vmatmul.mubr.msk.f32.vlgmr.msra.gmra.mrb[0].mxu0 %vm24_vm2, %v19_v7 }
  0xa6   :  { %23 = vst.msk [vmem:[%s221_s1] sm:$0x3] %vm22_vm3, %v21_v9  ;;  %s186_s1 = smov [#allocation2]  }
  0xa7   :  { %s132_s12 = sshll.u32 %s186_s1, 4  ;;  %s133_s12 = int_to_ptr.vmem [resolvable:$true] %s132_s12 }
  0xa8   :  { %s160_s13 = scalar_lea.vmem %s133_s12, 16  ;;  %s164_s14 = scalar_lea.vmem %s133_s12, 32 }
  0xa9   :  { %p161_p0 = scmp.ne.s32.totalorder %s133_s12, %s160_s13  ;;  %p165_p1 = scmp.lt.s32.totalorder %s133_s12, %s133_s12 }
  0xaa   :  { %p166_p2 = scmp.lt.s32.totalorder %s164_s14, %s160_s13 }
  0xac   :  { %p167_p3 = por %p166_p2, %p165_p1 }
  0xae   :  { %p168_p4 = pnand %p167_p3, %p161_p0 }
 0x178   :  { %v94_v10 = vpop.f32.mrb[0].mxu0 }
 0x179   :  { %v103_v11 = vmul.f32 1.442695, %v94_v10  ;;  %v150_v12 = vpop.f32.mrb[1].mxu0 }
 0x17b   :  { %156 = vpow2.f32 %v103_v11 }
 0x185   :  { %v157_v16 = vpop.eup %156 }
 0x186   :  { %v105_v17 = vsel %vm102_vm4, 0.0, %v157_v16 }
 0x187   :  { %v107_v18 = vsel %vm106_vm5, %v105_v17, 0.0 }
 0x188   :  { %108 = vadd.xlane.f32.xlu0 %v107_v18 }
 0x215   :  { %v109_v19 = vpop.xlane.xlu0 %108 }
 0x216   :  { %v111_v20 = vsel %vm110_vm6, %v109_v19, 0.0 }
 0x217   :  { %v112_v21 = vrot.slane %v111_v20, 4 }
 0x219   :  { %v113_v22 = vadd.f32 %v112_v21, %v111_v20 }
 0x21b   :  { %v114_v23 = vrot.slane %v113_v22, 2 }
 0x21d   :  { %v115_v24 = vadd.f32 %v114_v23, %v113_v22 }
 0x21f   :  { %v116_v25 = vrot.slane %v115_v24, 1 }
 0x221   :  { %v117_v26 = vadd.f32 %v116_v25, %v115_v24 }
 0x223   :  { %158 = vlog2.f32 %v117_v26 }
 0x22d   :  { %v159_v27 = vpop.eup %158 }
 0x22e   :  { %v119_v28 = vmul.f32 0.6931472, %v159_v27 }
 0x230   :  { %v121_v29 = vmul.f32 0.25, %v119_v28 }
 0x232   :  { %123 = vst.msk [vmem:[#allocation2] sm:$0x1] %vm122_vm7, %v121_v29 }
 0x233   :  { %171 = shalt.err (!%p168_p4)
}
 0x234   :  { %s172_s17 = scalar_lea.hbm %s222_s2, 16 }
 0x235   :  { %p173_p5 = scmp.ne.s32.totalorder %s222_s2, %s172_s17  ;;  %p176_p6 = scmp.lt.u32.totalorder %s172_s17, %s222_s2 }
 0x237   :  { %p178_p7 = pnand %p176_p6, %p173_p5 }
 0x239   :  { %181 = shalt.err (!%p178_p7)
}
 0x23a   :  { %135 = dma.vmem_to_hbm [thread:$0]  %s133_s12, 16, %s222_s2, [#allocation3]  }
 0x23b   :  { %182 = dma.done.wait [#allocation3], 16  }
 0x23c   :  { %183 = vsyncadd [#allocation3], 4294967280 }
 0x23d   :  { %141 = vsyncpa [#allocation3], 1 }

// kernel: itloss.3
= control target key start
LH: loop header
LB: loop body
LE: loop exit
PB: predicated region body
PF: predicated region fallthrough
CT: control target
= control target key end

     0   :  { %vm48_vm0 = vcmask 261120   ;;  %v159_v0 = vmov 0.0   ;;  %vm160_vm1 = vmmov 0   ;;  %v161_v5 = vmov 0   ;;  %s208_s3 = inlined_call_operand.vmem [shape: bf16[4,32], index: 3, kind: input, shape index: {}]   ;;  %s209_s0 = inlined_call_operand.vmem [shape: f32[8,32], index: 0, kind: input, shape index: {}]   ;;  %s210_s2 = inlined_call_operand.vmem [shape: s32[8,1], index: 2, kind: input, shape index: {}]   ;;  %s211_s1 = inlined_call_operand.vmem [shape: f32[8,4], index: 1, kind: input, shape index: {}]   ;;  %s212_s4 = inlined_call_operand.vmem [shape: f32[1,8,128], index: 4, kind: output, shape index: {}]  }
   0x1   :  { %140 = vmatprep.subr.bf16.mxu0 %v159_v0  ;;  %v47_v1 = vld [vmem:[%s208_s3] sm:$0x3]  ;;  %142 = vmatprep.mubr.msk.bf16.mxu0 %vm160_vm1, %v159_v0  ;;  %vm28_vm2 = vcmask 31744   ;;  %v20_v19 = vlaneseq }
   0x2   :  { %v53_v2 = vsel %vm48_vm0, %v47_v1, 0  ;;  %v45_v3 = vld [vmem:[%s209_s0] sm:$0xff]  ;;  %149 = vset.pattern.permute.xlu1 %v161_v5  ;;  %150 = vset.pattern.permute.xlu0 %v161_v5 }
   0x3   :  { %141 = vmatpush3.bf16.xpose.msra.mxu0 %v53_v2  ;;  %v46_v4 = vpack.c.bf16 %v45_v3, %v45_v3  ;;  %v19_v6 = vld [vmem:[%s210_s2] sm:$0xff]  ;;  %v21_v21 = vand.u32 127, %v20_v19  ;;  %v126_v50 = vshrl.u32 %v20_v19, 7 }
   0x4   :  { %23 = vperm.xlu1 %149, %v19_v6   ;;  %v18_v8 = vld [vmem:[%s211_s1] sm:$0xff] }
   0x5   :  { %v29_v13 = vsel %vm28_vm2, %v18_v8, -inf  ;;  %vm128_vm4 = vcmp.eq.s32.totalorder %v126_v50, 1  ;;  %vm127_vm5 = vcmp.eq.s32.totalorder %v126_v50, 0 }
   0xa   :  { %143 = vmatmul.mubr.msk.bf16.vlgmr.msra.gmra.mrb[0].mxu0 %vm48_vm0, %v46_v4 }
  0x83   :  { %v24_v22 = vpop.permute.xlu1 %23 }
  0x84   :  { %vm25_vm3 = vcmp.eq.s32.totalorder %v24_v22, %v21_v21 }
  0x85   :  { %v136_v25 = vsel %vm25_vm3, 1.0, %v159_v0 }
  0xdd   :  { %v89_v7 = vpop.f32.mrb[0].mxu0 }
  0xde   :  { %v144_v9 = vpop.f32.mrb[1].mxu0  ;;  %v95_v10 = vsel %vm28_vm2, %v89_v7, -inf }
  0xdf   :  { %96 = vmax.xlane.f32.xlu0 %v95_v10  ;;  %v92_v11 = vpop.f32.mrb[2].mxu0 }
  0xe0   :  { %v145_v12 = vpop.f32.mrb[3].mxu0 }
  0xe3   :  { %30 = vmax.xlane.f32.xlu0 %v29_v13 }
 0x16c   :  { %v97_v14 = vpop.xlane.xlu0 %96 }
 0x16d   :  { %v98_v15 = vsub.f32 %v89_v7, %v97_v14 }
 0x16f   :  { %v99_v16 = vmul.f32 1.442695, %v98_v15  ;;  %v106_v28 = vmul.f32 %v136_v25, %v98_v15 }
 0x170   :  { %v31_v17 = vpop.xlane.xlu0 %30 }
 0x171   :  { %151 = vpow2.f32 %v99_v16  ;;  %v32_v18 = vsub.f32 %v18_v8, %v31_v17  ;;  %v107_v29 = vsel %vm28_vm2, %v106_v28, 0.0 }
 0x173   :  { %v33_v20 = vmul.f32 1.442695, %v32_v18  ;;  %v40_v30 = vmul.f32 %v136_v25, %v32_v18 }
 0x175   :  { %153 = vpow2.f32 %v33_v20  ;;  %v41_v31 = vsel %vm28_vm2, %v40_v30, 0.0 }
 0x17b   :  { %v152_v23 = vpop.eup %151 }
 0x17c   :  { %v101_v24 = vsel %vm28_vm2, %v152_v23, 0.0 }
 0x17d   :  { %102 = vadd.xlane.f32.xlu1 %v101_v24 }
 0x17f   :  { %v154_v26 = vpop.eup %153 }
 0x180   :  { %v35_v27 = vsel %vm28_vm2, %v154_v26, 0.0 }
 0x181   :  { %36 = vadd.xlane.f32.xlu0 %v35_v27 }
 0x185   :  { %108 = vadd.xlane.f32.xlu0 %v107_v29 }
 0x189   :  { %42 = vadd.xlane.f32.xlu0 %v41_v31 }
 0x20a   :  { %v103_v32 = vpop.xlane.xlu1 %102 }
 0x20b   :  { %155 = vlog2.f32 %v103_v32 }
 0x20e   :  { %v37_v33 = vpop.xlane.xlu0 %36 }
 0x20f   :  { %157 = vlog2.f32 %v37_v33 }
 0x212   :  { %v109_v35 = vpop.xlane.xlu0 %108 }
 0x215   :  { %v156_v34 = vpop.eup %155 }
 0x216   :  { %v105_v36 = vmul.f32 0.6931472, %v156_v34  ;;  %v43_v41 = vpop.xlane.xlu0 %42 }
 0x218   :  { %v110_v37 = vsub.f32 %v109_v35, %v105_v36 }
 0x219   :  { %v158_v38 = vpop.eup %157 }
 0x21a   :  { %v118_v39 = vrot.slane %v110_v37, 4  ;;  %v39_v40 = vmul.f32 0.6931472, %v158_v38 }
 0x21c   :  { %v119_v42 = vadd.f32 %v118_v39, %v110_v37  ;;  %v44_v43 = vsub.f32 %v43_v41, %v39_v40 }
 0x21e   :  { %v120_v44 = vrot.slane %v119_v42, 2  ;;  %v111_v45 = vrot.slane %v44_v43, 4 }
 0x220   :  { %v121_v46 = vadd.f32 %v120_v44, %v119_v42  ;;  %v112_v47 = vadd.f32 %v111_v45, %v44_v43 }
 0x222   :  { %v122_v48 = vrot.slane %v121_v46, 1  ;;  %v113_v49 = vrot.slane %v112_v47, 2 }
 0x224   :  { %v123_v51 = vadd.f32 %v122_v48, %v121_v46  ;;  %v114_v52 = vadd.f32 %v113_v49, %v112_v47 }
 0x226   :  { %v115_v53 = vrot.slane %v114_v52, 1  ;;  %v124_v54 = vsub.f32 0.0, %v123_v51 }
 0x228   :  { %v116_v55 = vadd.f32 %v115_v53, %v114_v52  ;;  %v129_v57 = vsel %vm128_vm4, %v124_v54, 0.0 }
 0x22a   :  { %v117_v56 = vsub.f32 0.0, %v116_v55 }
 0x22c   :  { %v130_v58 = vsel %vm127_vm5, %v117_v56, %v129_v57 }
 0x22d   :  { %131 = vst [vmem:[%s212_s4] sm:$0xff] %v130_v58 }

</bundles_post_ra>
